<compile_context>
chip_gen: v5e
topology: v5e:2x2
jax: 0.10.0
libtpu: 0.0.40
codegen_flags: <defaults>
</compile_context>

<pallas_src>
import jax
import jax.numpy as jnp
import numpy as np
from jax.experimental import pallas as pl
from jax.experimental.pallas import tpu as pltpu


def _round_up(x, m):
    return (x + m - 1) // m * m


def _textcnn_kernel(x_ref, w_ref, b_ref, m_ref, o_ref):
    """One batch tile (TB rows) per grid step; all conv branches fused.

    x_ref: (TB*Lp, kmax*E) bf16  im2col'd, per-row zero-padded inputs
    w_ref: (kmax*E, C_pad) bf16  fused tap-stacked weights (zero taps for short k)
    b_ref: (1, C_pad)      f32   fused biases
    m_ref: (Lp, C_pad)     f32   validity mask (1 = valid window start, 0 = invalid)
    o_ref: (1, TB, C_pad)  f32   pooled output for this batch tile
    """
    M = x_ref.shape[0]
    Lp, C = m_ref.shape
    TB = M // Lp

    # Single wide MXU matmul: contraction over kmax*E, f32 accumulation.
    acc = jnp.dot(x_ref[...], w_ref[...], preferred_element_type=jnp.float32)

    # (TB*Lp, C_pad) -> (TB, Lp, C_pad): clean sublane split (Lp % 8 == 0,
    # C_pad % 128 == 0), no tile-crossing data movement.
    acc = acc.reshape(TB, Lp, C)

    # Select-style masking (robust to NaN/Inf in padded / out-of-window data),
    # then global max pool over window positions.
    valid = m_ref[...] > 0.0
    neg = jnp.finfo(jnp.float32).min
    pooled = jnp.max(jnp.where(valid[None, :, :], acc, neg), axis=1)     # (TB, C)

    # Bias + ReLU hoisted after the max (monotone per-channel ops commute w/ max).
    o_ref[0] = jnp.maximum(pooled + b_ref[...], 0.0)


def pack_textcnn_params(params, seq_len):
    """One-time packing of per-branch Conv1d params into fused kernel operands.

    params: list of (w, b) with w: (k, E, c) tap-major / channels-last, b: (c,).
    """
    ks = tuple(int(w.shape[0]) for w, _ in params)
    cs = tuple(int(w.shape[2]) for w, _ in params)
    E = int(params[0][0].shape[1])
    kmax = max(ks)
    assert seq_len >= kmax, (
        f"seq_len ({seq_len}) must be >= max kernel size ({kmax}), "
        "otherwise PyTorch Conv1d would fail")

    C = sum(cs)
    C_pad = _round_up(max(C, 128), 128)             # lane-dense channel dim
    Lp = _round_up(seq_len + kmax - 1, 8)           # per-row pad, sublane aligned
    K = kmax * E                                    # im2col contraction depth

    W = np.zeros((K, C_pad), np.float32)            # zero taps / zero pad channels
    bias = np.zeros((1, C_pad), np.float32)
    mask = np.zeros((Lp, C_pad), np.float32)        # 1 = valid window start
    off = 0
    for (w, b), k, c in zip(params, ks, cs):
        wf = np.asarray(w, np.float32)              # (k, E, c)
        for t in range(k):
            W[t * E:(t + 1) * E, off:off + c] = wf[t]
        bias[0, off:off + c] = np.asarray(b, np.float32)
        mask[:seq_len - k + 1, off:off + c] = 1.0   # valid starts: j <= L - k
        off += c

    return dict(
        W=jnp.asarray(W, jnp.bfloat16),
        bias=jnp.asarray(bias, jnp.float32),
        mask=jnp.asarray(mask, jnp.float32),
        kmax=kmax, C=C, C_pad=C_pad, Lp=Lp, L=seq_len, E=E, K=K)


def textcnn_forward(inputs, packed, *, tb=None):
    """Equivalent of TextCNN.forward.  inputs: (B, L, E) -> (B, sum(channels)) f32."""
    B, L, E = inputs.shape
    assert L == packed["L"] and E == packed["E"]
    kmax, C, C_pad = packed["kmax"], packed["C"], packed["C_pad"]
    Lp, K = packed["Lp"], packed["K"]

    if tb is None:
        # ~512 MXU rows per grid step (amortizes v5e's 4 MXU pipelines and the
        # per-step overhead; >= the 256 target for v6e's 256-wide MXU).
        tb = max(1, 512 // Lp)
        # Conservative VMEM cap so the tile also fits v7x's smaller VMEM / the
        # default scoped limit: double-buffered x tile + output + constants.
        const_bytes = 2 * (K * C_pad * 2 + Lp * C_pad * 4 + C_pad * 4)
        row_bytes = 2 * (Lp * K * 2) + 2 * (C_pad * 4)
        budget = 16 * 1024 * 1024
        tb = min(tb, max(1, (budget - const_bytes) // row_bytes))
    tb = max(1, min(tb, B))
    G = -(-B // tb)                       # ceil(B / tb)
    if G > 1 and G % 2:
        G += 1                            # even grid keeps v7x's 2 TCs balanced
    B_pad = G * tb

    # bf16 into the kernel; per-row zero pad to Lp, then im2col along the
    # sequence so the tap sum lives in the MXU K dimension.  Windows never wrap
    # into a neighboring batch row.
    xb = inputs.astype(jnp.bfloat16)
    xb = jnp.pad(xb, ((0, B_pad - B), (0, Lp - L), (0, 0)))          # (B_pad, Lp, E)
    cols = [xb] + [jnp.pad(xb[:, t:, :], ((0, 0), (0, t), (0, 0)))
                   for t in range(1, kmax)]
    x_win = jnp.concatenate(cols, axis=-1)                           # (B_pad, Lp, K)
    x_flat = x_win.reshape(B_pad * Lp, K)

    flops = 2 * B_pad * Lp * K * C_pad
    bytes_accessed = (x_flat.size * 2 + K * C_pad * 2
                      + Lp * C_pad * 4 + C_pad * 4 + B_pad * C_pad * 4)

    out = pl.pallas_call(
        _textcnn_kernel,
        out_shape=jax.ShapeDtypeStruct((G, tb, C_pad), jnp.float32),
        grid=(G,),
        in_specs=[
            pl.BlockSpec((tb * Lp, K), lambda i: (i, 0)),      # batch tile rows
            pl.BlockSpec((K, C_pad), lambda i: (0, 0)),        # fused weights
            pl.BlockSpec((1, C_pad), lambda i: (0, 0)),        # fused bias
            pl.BlockSpec((Lp, C_pad), lambda i: (0, 0)),       # validity mask
        ],
        out_specs=pl.BlockSpec((1, tb, C_pad), lambda i: (i, 0, 0)),
        compiler_params=pltpu.CompilerParams(
            dimension_semantics=("parallel",)),
        cost_estimate=pl.CostEstimate(flops=flops, transcendentals=0,
                                      bytes_accessed=bytes_accessed),
    )(x_flat, packed["W"], packed["bias"], packed["mask"])

    return out.reshape(B_pad, C_pad)[:B, :C]


def _reference(inputs, params):
    """Pure-JAX reference of TextCNN.forward (same bf16 operands, f32 accumulate)."""
    x = inputs.astype(jnp.bfloat16).astype(jnp.float32)
    B, L, E = x.shape
    outs = []
    for w, b in params:
        k, _, c = w.shape
        wf = w.astype(jnp.bfloat16).astype(jnp.float32)
        l_out = L - k + 1
        acc = jnp.zeros((B, l_out, c), jnp.float32)
        for t in range(k):
            acc = acc + jnp.einsum("ble,ec->blc", x[:, t:t + l_out, :], wf[t],
                                   precision=jax.lax.Precision.HIGHEST)
        acc = jax.nn.relu(acc + b.astype(jnp.float32))   # conv -> bias -> relu
        outs.append(jnp.max(acc, axis=1))                # global max pool
    return jnp.concatenate(outs, axis=1)


if __name__ == "__main__":
    # Small shapes consistent with the module: batch=2, seq=16, embed=32.
    B, L, E = 2, 16, 32
    kernel_sizes = (3, 4, 5)
    channel_nums = (8, 8, 16)

    key = jax.random.PRNGKey(0)
    kx, kp = jax.random.split(key)
    x = jax.random.normal(kx, (B, L, E), jnp.float32)

    # Deterministic parameter init (Conv1d-style uniform bounds), stored
    # directly in (k, E, c) tap-major / channels-last layout.
    params = []
    for i, (c, k) in enumerate(zip(channel_nums, kernel_sizes)):
        kw, kb = jax.random.split(jax.random.fold_in(kp, i))
        bound = 1.0 / np.sqrt(E * k)
        w = jax.random.uniform(kw, (k, E, c), jnp.float32, -bound, bound)
        b = jax.random.uniform(kb, (c,), jnp.float32, -bound, bound)
        params.append((w, b))

    packed = pack_textcnn_params(params, seq_len=L)
    fwd = jax.jit(lambda xx: textcnn_forward(xx, packed))

    out = jax.block_until_ready(fwd(x))
    ref = jax.block_until_ready(_reference(x, params))

    assert out.shape == (B, sum(channel_nums)), out.shape
    np.testing.assert_allclose(np.asarray(out), np.asarray(ref),
                               rtol=5e-4, atol=5e-4)
    print("KERNEL_OK")
</pallas_src>

<mosaic_0001>
module attributes {stable_mosaic.version = 11 : i64} {
  func.func @_textcnn_kernel(%arg0: i32, %arg1: memref<48x160xbf16, #tpu.memory_space<vmem>>, %arg2: memref<160x128xbf16, #tpu.memory_space<vmem>>, %arg3: memref<1x128xf32, #tpu.memory_space<vmem>>, %arg4: memref<24x128xf32, #tpu.memory_space<vmem>>, %arg5: memref<1x2x128xf32, #tpu.memory_space<vmem>>) attributes {dimension_semantics = [#tpu.dimension_semantics<parallel>], iteration_bounds = array<i64: 1>, scalar_prefetch = 0 : i64, scratch_operands = 0 : i64, tpu.core_type = #tpu.core_type<tc>, window_params = [{transform_indices = @transform_0, window_bounds = array<i64: 48, 160>}, {pipeline_mode = #tpu.pipeline_mode<synchronous>, transform_indices = @transform_1, window_bounds = array<i64: 160, 128>}, {pipeline_mode = #tpu.pipeline_mode<synchronous>, transform_indices = @transform_2, window_bounds = array<i64: 1, 128>}, {pipeline_mode = #tpu.pipeline_mode<synchronous>, transform_indices = @transform_3, window_bounds = array<i64: 24, 128>}, {transform_indices = @transform_4, window_bounds = array<i64: 1, 2, 128>}]} {
    %c0 = arith.constant 0 : index
    %c0_0 = arith.constant 0 : index
    %0 = vector.load %arg1[%c0, %c0_0] : memref<48x160xbf16, #tpu.memory_space<vmem>>, vector<48x160xbf16>
    %c0_1 = arith.constant 0 : index
    %c0_2 = arith.constant 0 : index
    %1 = vector.load %arg2[%c0_1, %c0_2] : memref<160x128xbf16, #tpu.memory_space<vmem>>, vector<160x128xbf16>
    %cst = arith.constant dense<0.000000e+00> : vector<48x128xf32>
    %2 = tpu.matmul %0, %1, %cst {dimension_numbers = #tpu.dot_dimension_numbers<[1], [0], [0], [1], [0, 0, 1, 1], [], []>} : vector<48x160xbf16>, vector<160x128xbf16>, vector<48x128xf32> -> vector<48x128xf32>
    %3 = vector.shape_cast %2 : vector<48x128xf32> to vector<2x24x128xf32>
    %c0_3 = arith.constant 0 : index
    %c0_4 = arith.constant 0 : index
    %4 = vector.load %arg4[%c0_3, %c0_4] : memref<24x128xf32, #tpu.memory_space<vmem>>, vector<24x128xf32>
    %cst_5 = arith.constant 0.000000e+00 : f32
    %5 = vector.broadcast %cst_5 : f32 to vector<24x128xf32>
    %6 = arith.cmpf ogt, %4, %5 : vector<24x128xf32>
    %7 = vector.shape_cast %6 : vector<24x128xi1> to vector<1x24x128xi1>
    %cst_6 = arith.constant -3.40282347E+38 : f32
    %8 = vector.shape_cast %7 : vector<1x24x128xi1> to vector<1x24x128xi1>
    %9 = vector.broadcast %8 : vector<1x24x128xi1> to vector<2x24x128xi1>
    %10 = vector.broadcast %cst_6 : f32 to vector<2x24x128xf32>
    %11 = arith.select %9, %3, %10 : vector<2x24x128xi1>, vector<2x24x128xf32>
    %cst_7 = arith.constant dense<0xFF800000> : vector<2x128xf32>
    %12 = vector.multi_reduction <maximumf>, %11, %cst_7 [1] : vector<2x24x128xf32> to vector<2x128xf32>
    %c0_8 = arith.constant 0 : index
    %c0_9 = arith.constant 0 : index
    %13 = vector.load %arg3[%c0_8, %c0_9] : memref<1x128xf32, #tpu.memory_space<vmem>>, vector<1x128xf32>
    %14 = vector.broadcast %13 : vector<1x128xf32> to vector<2x128xf32>
    %15 = arith.addf %12, %14 : vector<2x128xf32>
    %cst_10 = arith.constant 0.000000e+00 : f32
    %16 = vector.broadcast %cst_10 : f32 to vector<2x128xf32>
    %17 = arith.maximumf %15, %16 : vector<2x128xf32>
    %c0_11 = arith.constant 0 : index
    %c0_12 = arith.constant 0 : index
    %c0_13 = arith.constant 0 : index
    %18 = vector.load %arg5[%c0_11, %c0_12, %c0_13] : memref<1x2x128xf32, #tpu.memory_space<vmem>>, vector<1x2x128xf32>
    %19 = vector.shape_cast %18 : vector<1x2x128xf32> to vector<2x128xf32>
    %20 = vector.shape_cast %17 : vector<2x128xf32> to vector<1x2x128xf32>
    tpu.vector_store %arg5[%c0_11, %c0_12, %c0_13], %20 {strides = array<i32>} : memref<1x2x128xf32, #tpu.memory_space<vmem>>, vector<1x2x128xf32>,
    return
  }
  func.func @transform_0(%arg0: i32) -> (i32, i32) {
    %c0_i32 = arith.constant 0 : i32
    %c0_i32_0 = arith.constant 0 : i32
    return %arg0, %c0_i32 : i32, i32
  }
  func.func @transform_1(%arg0: i32) -> (i32, i32) {
    %c0_i32 = arith.constant 0 : i32
    %c0_i32_0 = arith.constant 0 : i32
    %c0_i32_1 = arith.constant 0 : i32
    return %c0_i32, %c0_i32_0 : i32, i32
  }
  func.func @transform_2(%arg0: i32) -> (i32, i32) {
    %c0_i32 = arith.constant 0 : i32
    %c0_i32_0 = arith.constant 0 : i32
    %c0_i32_1 = arith.constant 0 : i32
    return %c0_i32, %c0_i32_0 : i32, i32
  }
  func.func @transform_3(%arg0: i32) -> (i32, i32) {
    %c0_i32 = arith.constant 0 : i32
    %c0_i32_0 = arith.constant 0 : i32
    %c0_i32_1 = arith.constant 0 : i32
    return %c0_i32, %c0_i32_0 : i32, i32
  }
  func.func @transform_4(%arg0: i32) -> (i32, i32, i32) {
    %c0_i32 = arith.constant 0 : i32
    %c0_i32_0 = arith.constant 0 : i32
    %c0_i32_1 = arith.constant 0 : i32
    return %arg0, %c0_i32, %c0_i32_0 : i32, i32, i32
  }
}

</mosaic_0001>

<bundles_post_ra>
// kernel: _lambda_.1
= control target key start
LH: loop header
LB: loop body
LE: loop exit
PB: predicated region body
PF: predicated region fallthrough
CT: control target
= control target key end

     0   :  { %vm132_vm0 = vcmask 261120   ;;  %s498_s0 = inlined_call_operand.vmem [shape: bf16[48,160], index: 0, kind: input, shape index: {}]   ;;  %s499_s1 = inlined_call_operand.vmem [shape: bf16[160,128], index: 1, kind: input, shape index: {}]   ;;  %s500_s2 = inlined_call_operand.vmem [shape: f32[1,128], index: 2, kind: input, shape index: {}]   ;;  %s501_s3 = inlined_call_operand.vmem [shape: f32[24,128], index: 3, kind: input, shape index: {}]   ;;  %s502_s4 = inlined_call_operand.hbm [shape: f32[1,2,128], index: 4, kind: output, shape index: {}]  }
   0x1   :  { %v335_v0 = vld [vmem:[%s499_s1 + $0x38] sm:$0xff]  ;;  %v337_v1 = vld [vmem:[%s499_s1 + $0x48] sm:$0xff]  ;;  %v334_v2 = vld [vmem:[%s499_s1 + $0x30] sm:$0xff] }
   0x2   :  { %142 = vmatpush.bf16.msra.mxu0 %v335_v0  ;;  %338 = vmatpush.bf16.msra.mxu2 %v335_v0  ;;  %v336_v3 = vld [vmem:[%s499_s1 + $0x40] sm:$0xff]  ;;  %v259_v5 = vld [vmem:[%s498_s0 + $0x8] sm:$0xf0] }
   0x3   :  { %339 = vmatpush.bf16.msra.mxu3 %v335_v0  ;;  %172 = vmatpush.bf16.msra.mxu1 %v337_v1  ;;  %v322_v4 = vld [vmem:[%s498_s0 + $0x4] sm:$0xf]  ;;  %v333_v7 = vld [vmem:[%s499_s1 + $0x28] sm:$0xff] }
   0x4   :  { %v262_v6 = vor.u32 %v322_v4, %v259_v5 }
   0x6   :  { %143 = vmatpush.bf16.msra.mxu0 %v334_v2  ;;  %340 = vmatpush.bf16.msra.mxu2 %v334_v2 }
   0x7   :  { %341 = vmatpush.bf16.msra.mxu3 %v334_v2  ;;  %173 = vmatpush.bf16.msra.mxu1 %v336_v3 }
   0x8   :  { %9 = vsyncpa [#allocation3], 0  ;;  %v332_v8 = vld [vmem:[%s499_s1 + $0x20] sm:$0xff]  ;;  %v331_v9 = vld [vmem:[%s499_s1 + $0x18] sm:$0xff]  ;;  %s382_s12 = smov [#allocation2]   ;;  %s246_s16 = sshll.u32 %s502_s4, 4  ;;  %s247_s16 = int_to_ptr.hbm [resolvable:$true] %s246_s16 }
   0x9   :  { %v330_v10 = vld [vmem:[%s499_s1 + $0x10] sm:$0xff]  ;;  %v267_v12 = vld [vmem:[%s498_s0 + $0x18] sm:$0xf0]  ;;  %v329_v14 = vld [vmem:[%s499_s1 + $0x8] sm:$0xff]  ;;  %s244_s13 = sshll.u32 %s382_s12, 4  ;;  %vm235_vm4 = vcmask 1041409   ;;  %s245_s13 = int_to_ptr.vmem [resolvable:$true] %s244_s13 }
   0xa   :  { %319 = vmatmul.msk.bf16.vlgmr.msra.gmra.mxu1 %vm132_vm0, %v262_v6  ;;  %144 = vmatpush.bf16.msra.mxu0 %v333_v7  ;;  %v324_v11 = vld [vmem:[%s498_s0 + $0x14] sm:$0xf]  ;;  %v328_v15 = vld [vmem:[%s499_s1] sm:$0xff]  ;;  %v323_v17 = vld [vmem:[%s498_s0 + $0x4] sm:$0xf0] }
   0xb   :  { %342 = vmatpush.bf16.msra.mxu2 %v333_v7  ;;  %343 = vmatpush.bf16.msra.mxu3 %v333_v7  ;;  %v270_v13 = vor.u32 %v324_v11, %v267_v12  ;;  %v257_v16 = vld [vmem:[%s498_s0] sm:$0xf]  ;;  %v265_v18 = vld [vmem:[%s498_s0 + $0x10] sm:$0xf]  ;;  %v325_v19 = vld [vmem:[%s498_s0 + $0x14] sm:$0xf0] }
   0xc   :  { %v273_v20 = vld [vmem:[%s498_s0 + $0x20] sm:$0xf]  ;;  %v327_v21 = vld [vmem:[%s498_s0 + $0x24] sm:$0xf0]  ;;  %v258_v22 = vor.u32 %v323_v17, %v257_v16  ;;  %v266_v23 = vor.u32 %v325_v19, %v265_v18  ;;  %v326_v25 = vld [vmem:[%s498_s0 + $0x24] sm:$0xf] }
   0xd   :  { %v274_v24 = vor.u32 %v327_v21, %v273_v20  ;;  %v275_v26 = vld [vmem:[%s498_s0 + $0x28] sm:$0xf0]  ;;  %v190_v33 = vld [vmem:[%s501_s3] sm:$0xff]  ;;  %v192_v34 = vld [vmem:[%s501_s3 + $0x10] sm:$0xff] }
   0xe   :  { %145 = vmatpush.bf16.msra.mxu0 %v332_v8  ;;  %v278_v27 = vor.u32 %v326_v25, %v275_v26  ;;  %v191_v35 = vld [vmem:[%s501_s3 + $0x8] sm:$0xff]  ;;  %vm193_vm1 = vcmp.gt.f32.partialorder %v190_v33, 0.0  ;;  %vm195_vm2 = vcmp.gt.f32.partialorder %v192_v34, 0.0  ;;  %v355_v6 = vld [vmem:[%s500_s2] ss:$0 sm:$0xff] }
   0xf   :  { %344 = vmatpush.bf16.msra.mxu2 %v332_v8  ;;  %345 = vmatpush.bf16.msra.mxu3 %v332_v8  ;;  %vm194_vm3 = vcmp.gt.f32.partialorder %v191_v35, 0.0 }
  0x12   :  { %146 = vmatpush.bf16.msra.mxu0 %v331_v9 }
  0x13   :  { %346 = vmatpush.bf16.msra.mxu2 %v331_v9  ;;  %347 = vmatpush.bf16.msra.mxu3 %v331_v9 }
  0x16   :  { %147 = vmatpush.bf16.msra.mxu0 %v330_v10 }
  0x17   :  { %348 = vmatpush.bf16.msra.mxu2 %v330_v10  ;;  %349 = vmatpush.bf16.msra.mxu3 %v330_v10 }
  0x1a   :  { %320 = vmatmul.msk.bf16.gmra.mxu1 %vm132_vm0, %v270_v13  ;;  %148 = vmatpush.bf16.msra.mxu0 %v329_v14 }
  0x1b   :  { %350 = vmatpush.bf16.msra.mxu2 %v329_v14  ;;  %351 = vmatpush.bf16.msra.mxu3 %v329_v14 }
  0x1e   :  { %149 = vmatpush.bf16.msra.mxu0 %v328_v15 }
  0x1f   :  { %352 = vmatpush.bf16.msra.mxu2 %v328_v15  ;;  %353 = vmatpush.bf16.msra.mxu3 %v328_v15 }
  0x21   :  { %150 = vmatmul.bf16.vlgmr.msra.gmra.mxu0 %v258_v22 }
  0x22   :  { %155 = vmatmul.bf16.vlgmr.msra.gmra.mxu2 %v266_v23  ;;  %160 = vmatmul.bf16.vlgmr.msra.gmra.mxu3 %v274_v24 }
  0x2a   :  { %321 = vmatmul.msk.bf16.gmra.mxu1 %vm132_vm0, %v278_v27 }
  0x87   :  { %v175_v28 = vpop.f32.mrf.mxu1 }
  0x8f   :  { %v177_v29 = vpop.f32.mrf.mxu1 }
  0x97   :  { %v180_v30 = vpop.f32.mrf.mxu1 }
  0x9e   :  { %v151_v31 = vpop.f32.mrf.mxu0 }
  0x9f   :  { %v182_v32 = vpop.f32.mrf.mxu1  ;;  %v176_v36 = vadd.f32 %v175_v28, %v151_v31 }
  0xa1   :  { %v202_v43 = vsel %vm193_vm1, %v176_v36, -3.4028235e+38 }
  0xa5   :  { %v156_v37 = vpop.f32.mrf.mxu2  ;;  %v161_v38 = vpop.f32.mrf.mxu3 }
  0xa6   :  { %v181_v39 = vadd.f32 %v180_v30, %v156_v37  ;;  %v153_v40 = vpop.f32.mrf.mxu0 }
  0xa7   :  { %v178_v41 = vadd.f32 %v177_v29, %v153_v40  ;;  %v185_v42 = vpop.f32.mrf.mxu1 }
  0xa8   :  { %v204_v44 = vsel %vm195_vm2, %v181_v39, -3.4028235e+38  ;;  %v186_v54 = vadd.f32 %v185_v42, %v161_v38 }
  0xa9   :  { %v208_v45 = vmax.f32 %v202_v43, %v204_v44  ;;  %v203_v46 = vsel %vm194_vm3, %v178_v41, -3.4028235e+38 }
  0xaa   :  { %v206_v60 = vsel %vm194_vm3, %v186_v54, -3.4028235e+38 }
  0xab   :  { %v209_v47 = vmax.f32 %v208_v45, %v203_v46 }
  0xad   :  { %v210_v48 = vrot.slane %v209_v47, 4  ;;  %v158_v49 = vpop.f32.mrf.mxu2  ;;  %v163_v52 = vpop.f32.mrf.mxu3 }
  0xae   :  { %v183_v50 = vadd.f32 %v182_v32, %v158_v49 }
  0xaf   :  { %v211_v51 = vmax.f32 %v209_v47, %v210_v48  ;;  %v187_v53 = vpop.f32.mrf.mxu1 }
  0xb0   :  { %v188_v55 = vadd.f32 %v187_v53, %v163_v52  ;;  %v205_v56 = vsel %vm193_vm1, %v183_v50, -3.4028235e+38 }
  0xb1   :  { %v212_v58 = vrot.slane %v211_v51, 2 }
  0xb2   :  { %v207_v57 = vsel %vm195_vm2, %v188_v55, -3.4028235e+38 }
  0xb3   :  { %v216_v59 = vmax.f32 %v205_v56, %v207_v57  ;;  %v213_v62 = vmax.f32 %v211_v51, %v212_v58 }
  0xb5   :  { %v217_v61 = vmax.f32 %v216_v59, %v206_v60  ;;  %v214_v1 = vrot.slane %v213_v62, 1 }
  0xb7   :  { %v218_v63 = vrot.slane %v217_v61, 4  ;;  %v215_v4 = vmax.f32 %v213_v62, %v214_v1 }
  0xb9   :  { %v219_v0 = vmax.f32 %v217_v61, %v218_v63  ;;  %v228_v8 = vadd.f32 %v355_v6, %v215_v4 }
  0xbb   :  { %v220_v2 = vrot.slane %v219_v0, 2  ;;  %v230_v11 = vmax.f32 %v228_v8, 0.0 }
  0xbd   :  { %v221_v3 = vmax.f32 %v219_v0, %v220_v2 }
  0xbf   :  { %v222_v5 = vrot.slane %v221_v3, 1 }
  0xc1   :  { %v223_v7 = vmax.f32 %v221_v3, %v222_v5 }
  0xc3   :  { %v229_v9 = vadd.f32 %v355_v6, %v223_v7 }
  0xc5   :  { %v231_v10 = vmax.f32 %v229_v9, 0.0 }
  0xc7   :  { %v234_v12 = vrot.slane %v231_v10, 7 }
  0xc9   :  { %v236_v13 = vsel %vm235_vm4, %v234_v12, %v230_v11 }
  0xca   :  { %238 = vst [vmem:[#allocation2] sm:$0x3] %v236_v13 }
  0xcb   :  { %249 = dma.vmem_to_hbm [thread:$0]  %s245_s13, 32, %s247_s16, [#allocation3]  }
  0xcc   :  { %380 = dma.done.wait [#allocation3], 32  }
  0xcd   :  { %381 = vsyncadd [#allocation3], 4294967264 }
  0xce   :  { %254 = vsyncpa [#allocation3], 1 }

</bundles_post_ra>
